<compile_context>
chip_gen: v5e
topology: v5e:2x2
jax: 0.10.0
libtpu: 0.0.40
codegen_flags: <defaults>
</compile_context>

<pallas_src>
import jax
import jax.numpy as jnp
import numpy as np
from jax.experimental import pallas as pl
from jax.experimental.pallas import tpu as pltpu


def build_grid(resolution):
    """Same as slot_attention build_grid: (1, H, W, 2*len(resolution)) float32."""
    ranges = [np.linspace(0.0, 1.0, num=res) for res in resolution]
    grid = np.meshgrid(*ranges, sparse=False, indexing="ij")
    grid = np.stack(grid, axis=-1)
    grid = np.reshape(grid, [resolution[0], resolution[1], -1])
    grid = np.expand_dims(grid, axis=0).astype(np.float32)
    return np.concatenate([grid, 1.0 - grid], axis=-1)  # (1, H, W, 4)


def _soft_pos_kernel(g_ref, w_ref, b_ref, x_ref, o_ref):
    # g_ref: (Cin, hw_tile) position grid (transposed, lane-dense)
    # w_ref: (C, Cin) torch-layout Linear weight; b_ref: (C, 1) bias
    # x_ref / o_ref: (C, hw_tile) -- one (batch, hw-tile) block, batch dim squeezed
    cin = g_ref.shape[0]
    x = x_ref[...].astype(jnp.float32)
    g = g_ref[...].astype(jnp.float32)
    w = w_ref[...].astype(jnp.float32)
    acc = x + b_ref[...].astype(jnp.float32)          # (C, hw) + (C, 1) broadcast
    for k in range(cin):                              # Cin == 4: unrolled VPU FMAs
        acc = acc + w[:, k:k + 1] * g[k:k + 1, :]     # (C,1)*(1,hw) broadcast mul
    o_ref[...] = acc.astype(o_ref.dtype)


def _pick_hw_tile(hw, c, itemsize, max_block_bytes=2 << 20):
    """Largest multiple-of-128 divisor of hw whose (c, tile) block fits the budget."""
    if hw % 128 != 0:
        return hw                       # block == full array dim is always legal
    cap = max(128, max_block_bytes // max(1, c * itemsize))
    best, found = hw, False
    t = 128
    while t <= hw:
        if hw % t == 0 and t <= cap:
            best, found = t, True
        t += 128
    return best if found else hw


@jax.jit
def soft_position_embed(x_nchw, grid_hw4, weight, bias):
    """x_nchw: (B, C, H, W); grid_hw4: (1, H, W, Cin); weight: (C, Cin) torch-style
    nn.Linear weight; bias: (C,).  Returns x + dense(grid).permute(0,3,1,2)."""
    B, C, H, W = x_nchw.shape
    Cin = grid_hw4.shape[-1]
    HW = H * W

    x = x_nchw.reshape(B, C, HW)                 # pure view, no transpose
    g_t = grid_hw4.reshape(HW, Cin).T            # (Cin, HW): 4 sublanes x HW lanes
    b = bias.reshape(C, 1)

    hw_tile = _pick_hw_tile(HW, C, x.dtype.itemsize)
    n_hw = HW // hw_tile

    out = pl.pallas_call(
        _soft_pos_kernel,
        out_shape=jax.ShapeDtypeStruct((B, C, HW), x.dtype),
        grid_spec=pltpu.PrefetchScalarGridSpec(
            num_scalar_prefetch=0,
            grid=(B, n_hw),
            in_specs=[
                pl.BlockSpec((Cin, hw_tile), lambda i, j: (0, j)),   # grid (shared)
                pl.BlockSpec((C, Cin), lambda i, j: (0, 0)),         # weight (shared)
                pl.BlockSpec((C, 1), lambda i, j: (0, 0)),           # bias (shared)
                pl.BlockSpec((None, C, hw_tile), lambda i, j: (i, 0, j)),  # x (batch squeezed)
            ],
            out_specs=pl.BlockSpec((None, C, hw_tile), lambda i, j: (i, 0, j)),
        ),
        compiler_params=pltpu.CompilerParams(
            dimension_semantics=("parallel", "parallel")),
        input_output_aliases={3: 0},             # out = x + emb: reuse x's HBM buffer
    )(g_t, weight, b, x)

    return out.reshape(B, C, H, W)


if __name__ == "__main__":
    # Shapes consistent with the module: num_channels=3 -> in_features=4 (matches
    # the 4-channel grid), hidden_size=32, resolution=(16, 16), batch=2.
    num_channels = 3
    hidden_size = 32
    resolution = (16, 16)
    B = 2

    key = jax.random.PRNGKey(0)
    k_x, k_w, k_b = jax.random.split(key, 3)

    # Inputs are NCHW with C == hidden_size (what the assert in forward implies).
    x = jax.random.normal(k_x, (B, hidden_size, *resolution), dtype=jnp.float32)

    # Deterministic Linear params (torch convention: weight (out, in), bias (out,)).
    in_features = num_channels + 1
    weight = jax.random.normal(k_w, (hidden_size, in_features), dtype=jnp.float32) * 0.1
    bias = jax.random.normal(k_b, (hidden_size,), dtype=jnp.float32) * 0.1

    grid_buf = jnp.asarray(build_grid(resolution))   # (1, H, W, 4)

    out = soft_position_embed(x, grid_buf, weight, bias)
    out = jax.block_until_ready(out)

    # Pure-JAX reference (same math as the PyTorch forward).
    emb_ref = jnp.einsum("hwk,ck->hwc", grid_buf[0], weight) + bias     # (H, W, C)
    ref = x + jnp.transpose(emb_ref, (2, 0, 1))[None]                   # (B, C, H, W)
    assert out.shape == x.shape and out.dtype == x.dtype
    np.testing.assert_allclose(np.asarray(out), np.asarray(ref), rtol=1e-5, atol=1e-5)

    print("KERNEL_OK")
</pallas_src>

<mosaic_0001>
module attributes {stable_mosaic.version = 11 : i64} {
  func.func @_soft_pos_kernel(%arg0: i32, %arg1: i32, %arg2: memref<4x256xf32, #tpu.memory_space<vmem>>, %arg3: memref<32x4xf32, #tpu.memory_space<vmem>>, %arg4: memref<32x1xf32, #tpu.memory_space<vmem>>, %arg5: memref<1x32x256xf32, #tpu.memory_space<vmem>>, %arg6: memref<1x32x256xf32, #tpu.memory_space<vmem>>) attributes {dimension_semantics = [#tpu.dimension_semantics<parallel>, #tpu.dimension_semantics<parallel>], iteration_bounds = array<i64: 2, 1>, scalar_prefetch = 0 : i64, scratch_operands = 0 : i64, tpu.core_type = #tpu.core_type<tc>, window_params = [{transform_indices = @transform_0, window_bounds = array<i64: 4, 256>}, {pipeline_mode = #tpu.pipeline_mode<synchronous>, transform_indices = @transform_1, window_bounds = array<i64: 32, 4>}, {pipeline_mode = #tpu.pipeline_mode<synchronous>, transform_indices = @transform_2, window_bounds = array<i64: 32, 1>}, {transform_indices = @transform_3, window_bounds = array<i64: 1, 32, 256>}, {transform_indices = @transform_4, window_bounds = array<i64: 1, 32, 256>}]} {
    %c0 = arith.constant 0 : index
    %c0_0 = arith.constant 0 : index
    %c0_1 = arith.constant 0 : index
    %0 = vector.load %arg5[%c0, %c0_0, %c0_1] : memref<1x32x256xf32, #tpu.memory_space<vmem>>, vector<1x32x256xf32>
    %1 = vector.shape_cast %0 : vector<1x32x256xf32> to vector<32x256xf32>
    %c0_2 = arith.constant 0 : index
    %c0_3 = arith.constant 0 : index
    %2 = vector.load %arg2[%c0_2, %c0_3] : memref<4x256xf32, #tpu.memory_space<vmem>>, vector<4x256xf32>
    %c0_4 = arith.constant 0 : index
    %c0_5 = arith.constant 0 : index
    %3 = vector.load %arg3[%c0_4, %c0_5] : memref<32x4xf32, #tpu.memory_space<vmem>>, vector<32x4xf32>
    %c0_6 = arith.constant 0 : index
    %c0_7 = arith.constant 0 : index
    %4 = vector.load %arg4[%c0_6, %c0_7] : memref<32x1xf32, #tpu.memory_space<vmem>>, vector<32x1xf32>
    %5 = vector.broadcast %4 : vector<32x1xf32> to vector<32x256xf32>
    %6 = arith.addf %1, %5 : vector<32x256xf32>
    %7 = vector.extract_strided_slice %3 {offsets = [0, 0], sizes = [32, 1], strides = [1, 1]} : vector<32x4xf32> to vector<32x1xf32>
    %8 = vector.extract_strided_slice %2 {offsets = [0, 0], sizes = [1, 256], strides = [1, 1]} : vector<4x256xf32> to vector<1x256xf32>
    %9 = vector.broadcast %7 : vector<32x1xf32> to vector<32x256xf32>
    %10 = vector.broadcast %8 : vector<1x256xf32> to vector<32x256xf32>
    %11 = arith.mulf %9, %10 : vector<32x256xf32>
    %12 = arith.addf %6, %11 : vector<32x256xf32>
    %13 = vector.extract_strided_slice %3 {offsets = [0, 1], sizes = [32, 1], strides = [1, 1]} : vector<32x4xf32> to vector<32x1xf32>
    %14 = vector.extract_strided_slice %2 {offsets = [1, 0], sizes = [1, 256], strides = [1, 1]} : vector<4x256xf32> to vector<1x256xf32>
    %15 = vector.broadcast %13 : vector<32x1xf32> to vector<32x256xf32>
    %16 = vector.broadcast %14 : vector<1x256xf32> to vector<32x256xf32>
    %17 = arith.mulf %15, %16 : vector<32x256xf32>
    %18 = arith.addf %12, %17 : vector<32x256xf32>
    %19 = vector.extract_strided_slice %3 {offsets = [0, 2], sizes = [32, 1], strides = [1, 1]} : vector<32x4xf32> to vector<32x1xf32>
    %20 = vector.extract_strided_slice %2 {offsets = [2, 0], sizes = [1, 256], strides = [1, 1]} : vector<4x256xf32> to vector<1x256xf32>
    %21 = vector.broadcast %19 : vector<32x1xf32> to vector<32x256xf32>
    %22 = vector.broadcast %20 : vector<1x256xf32> to vector<32x256xf32>
    %23 = arith.mulf %21, %22 : vector<32x256xf32>
    %24 = arith.addf %18, %23 : vector<32x256xf32>
    %25 = vector.extract_strided_slice %3 {offsets = [0, 3], sizes = [32, 1], strides = [1, 1]} : vector<32x4xf32> to vector<32x1xf32>
    %26 = vector.extract_strided_slice %2 {offsets = [3, 0], sizes = [1, 256], strides = [1, 1]} : vector<4x256xf32> to vector<1x256xf32>
    %27 = vector.broadcast %25 : vector<32x1xf32> to vector<32x256xf32>
    %28 = vector.broadcast %26 : vector<1x256xf32> to vector<32x256xf32>
    %29 = arith.mulf %27, %28 : vector<32x256xf32>
    %30 = arith.addf %24, %29 : vector<32x256xf32>
    %c0_8 = arith.constant 0 : index
    %c0_9 = arith.constant 0 : index
    %c0_10 = arith.constant 0 : index
    %31 = vector.load %arg6[%c0_8, %c0_9, %c0_10] : memref<1x32x256xf32, #tpu.memory_space<vmem>>, vector<1x32x256xf32>
    %32 = vector.shape_cast %31 : vector<1x32x256xf32> to vector<32x256xf32>
    %33 = vector.shape_cast %30 : vector<32x256xf32> to vector<1x32x256xf32>
    tpu.vector_store %arg6[%c0_8, %c0_9, %c0_10], %33 {strides = array<i32>} : memref<1x32x256xf32, #tpu.memory_space<vmem>>, vector<1x32x256xf32>,
    return
  }
  func.func @transform_0(%arg0: i32, %arg1: i32) -> (i32, i32) {
    %c0_i32 = arith.constant 0 : i32
    %c0_i32_0 = arith.constant 0 : i32
    return %c0_i32, %arg1 : i32, i32
  }
  func.func @transform_1(%arg0: i32, %arg1: i32) -> (i32, i32) {
    %c0_i32 = arith.constant 0 : i32
    %c0_i32_0 = arith.constant 0 : i32
    %c0_i32_1 = arith.constant 0 : i32
    return %c0_i32, %c0_i32_0 : i32, i32
  }
  func.func @transform_2(%arg0: i32, %arg1: i32) -> (i32, i32) {
    %c0_i32 = arith.constant 0 : i32
    %c0_i32_0 = arith.constant 0 : i32
    %c0_i32_1 = arith.constant 0 : i32
    return %c0_i32, %c0_i32_0 : i32, i32
  }
  func.func @transform_3(%arg0: i32, %arg1: i32) -> (i32, i32, i32) {
    %c0_i32 = arith.constant 0 : i32
    %c0_i32_0 = arith.constant 0 : i32
    return %arg0, %c0_i32, %arg1 : i32, i32, i32
  }
  func.func @transform_4(%arg0: i32, %arg1: i32) -> (i32, i32, i32) {
    %c0_i32 = arith.constant 0 : i32
    %c0_i32_0 = arith.constant 0 : i32
    return %arg0, %c0_i32, %arg1 : i32, i32, i32
  }
}

</mosaic_0001>

<bundles_post_ra>
// kernel: soft_position_embed.1
= control target key start
LH: loop header
LB: loop body
LE: loop exit
PB: predicated region body
PF: predicated region fallthrough
CT: control target
= control target key end

     0   :  { %s678_s15 = smov 0   ;;  %s680_s16 = smov 0   ;;  %s835_s0 = inlined_call_operand.vmem [shape: f32[4,256], index: 0, kind: input, shape index: {}]   ;;  %s836_s1 = inlined_call_operand.vmem [shape: f32[32,4], index: 1, kind: input, shape index: {}]   ;;  %s837_s2 = inlined_call_operand.vmem [shape: f32[32,1], index: 2, kind: input, shape index: {}]   ;;  %s838_s3 = inlined_call_operand.vmem [shape: f32[2,32,256], index: 3, kind: input, shape index: {}, may-alias: {3,4}]   ;;  %s839_s4 = inlined_call_operand.vmem [shape: f32[2,32,256], index: 4, kind: output, shape index: {}, may-alias: {3,4}]  }
   0x1   :  { %s682_s17 = smov 0  }
   0x2 LB: > { %s26_s18 = sadd.s32 1, %s643_s16  ;;  %p576_p0 = scmp.ge.s32.totalorder %s647_s17, 1  ;;  %s647_s17 = sphi %s682_s17, %s14_s17   ;;  %s643_s16 = sphi %s680_s16, %s841_s16   ;;  %s639_s15 = sphi %s678_s15, %s840_s15  }
   0x3   : > { %p28_p1 = scmp.ge.s32.totalorder %s26_s18, 2  ;;  %p194_p2 = scmp.lt.s32.totalorder %s647_s17, 3 }
   0x5   : > { %s843_s18 = smov (%p28_p1, %s26_s18), 0  ;;  %p195_p3 = pnand %p576_p0, %p194_p2 }
   0x6   : > { %p240_p4 = scmp.lt.s32.totalorder (!%p195_p3), %s639_s15, 1 }
   0x7   : > { %198 = sbr.rel (%p195_p3) target bundleno = 186 (0xba), region = 36 }
   0xc   : > { %v274_v0 = vld [vmem:[%s837_s2 + $0x10] sm:$0xff]  ;;  %v272_v1 = vld [vmem:[%s837_s2] sm:$0xff]  ;;  %v649_v2 = vmov 0   ;;  %v275_v4 = vld [vmem:[%s837_s2 + $0x18] sm:$0xff]  ;;  %v650_v9 = vmov 1   ;;  %v651_v10 = vmov 2  }
   0xd   : > { %614 = vset.pattern.permute.xlu1 %v649_v2  ;;  %613 = vset.pattern.permute.xlu0 %v649_v2  ;;  %v268_v3 = vld [vmem:[%s836_s1] sm:$0xff]  ;;  %v273_v5 = vld [vmem:[%s837_s2 + $0x8] sm:$0xff]  ;;  %v271_v7 = vld [vmem:[%s836_s1 + $0x18] sm:$0xff]  ;;  %v652_v11 = vmov 3   ;;  %s845_s15 = smov (!%p240_p4, %s639_s15), 1 }
   0xe   : > { %288 = vperm.xlu1 %614, %v274_v0   ;;  %278 = vperm.xlu0 %613, %v272_v1   ;;  %v269_v6 = vld [vmem:[%s836_s1 + $0x8] sm:$0xff]  ;;  %v270_v8 = vld [vmem:[%s836_s1 + $0x10] sm:$0xff]  ;;  %v267_v21 = vld [vmem:[%s835_s0] sm:$0xff]  ;;  %s583_s11 = sshll.u32 %s845_s15, 6 }
   0xf   : > { %615 = vset.pattern.permute.xlu2 %v649_v2  ;;  %v325_v22 = vperm.slane %v267_v21, 0  ;;  %v326_v25 = vperm.slane %v267_v21, 4  ;;  %s745_s14 = scalar_lea.vmem %s838_s3, %s583_s11  ;;  %v363_v27 = vperm.slane %v267_v21, 1  ;;  %v364_v28 = vperm.slane %v267_v21, 5  ;;  %s792_s21 = scalar_lea.vmem %s839_s4, %s583_s11 }
  0x10   : > { %306 = vperm.xlu2 %615, %v268_v3   ;;  %v259_v30 = vld [vmem:[%s745_s14] sm:$0xff]  ;;  %v260_v32 = vld [vmem:[%s745_s14 + $0x8] sm:$0xff]  ;;  %v439_v41 = vperm.slane %v267_v21, 3  ;;  %v440_v42 = vperm.slane %v267_v21, 7  ;;  %v401_v45 = vperm.slane %v267_v21, 2  ;;  %v402_v46 = vperm.slane %v267_v21, 6 }
  0x11   : > { %v747_v26 = vperm.slane %v325_v22, 0  ;;  %v749_v29 = vperm.slane %v326_v25, 0  ;;  %v754_v35 = vperm.slane %v363_v27, 1  ;;  %v756_v36 = vperm.slane %v364_v28, 1  ;;  %v263_v43 = vld [vmem:[%s745_s14 + $0x20] sm:$0xff]  ;;  %v264_v44 = vld [vmem:[%s745_s14 + $0x28] sm:$0xff] }
  0x12   : > { %v767_v53 = vperm.slane %v439_v41, 3  ;;  %v769_v54 = vperm.slane %v440_v42, 3  ;;  %v773_v59 = vperm.slane %v401_v45, 2  ;;  %v406_v0 = vperm.slane %v402_v46, 2  ;;  %v265_v2 = vld [vmem:[%s745_s14 + $0x30] sm:$0xff] }
  0x16   : > { %293 = vperm.xlu1 %614, %v275_v4   ;;  %283 = vperm.xlu0 %613, %v273_v5  }
  0x18   : > { %311 = vperm.xlu2 %615, %v269_v6  }
  0x1e   : > { %321 = vperm.xlu1 %614, %v271_v7   ;;  %316 = vperm.xlu0 %613, %v270_v8  }
  0x20   : > { %616 = vset.pattern.permute.xlu2 %v650_v9 }
  0x21   : > { %348 = vperm.xlu2 %616, %v268_v3  }
  0x26   : > { %618 = vset.pattern.permute.xlu1 %v650_v9  ;;  %617 = vset.pattern.permute.xlu0 %v650_v9 }
  0x27   : > { %356 = vperm.xlu1 %618, %v270_v8   ;;  %352 = vperm.xlu0 %617, %v269_v6  }
  0x29   : > { %360 = vperm.xlu2 %616, %v271_v7  }
  0x2f   : > { %619 = vset.pattern.permute.xlu1 %v651_v10  ;;  %621 = vset.pattern.permute.xlu0 %v651_v10 }
  0x30   : > { %394 = vperm.xlu0 %621, %v270_v8   ;;  %386 = vperm.xlu1 %619, %v268_v3  }
  0x31   : > { %620 = vset.pattern.permute.xlu2 %v651_v10 }
  0x32   : > { %390 = vperm.xlu2 %620, %v269_v6  }
  0x38   : > { %398 = vperm.xlu1 %619, %v271_v7   ;;  %624 = vset.pattern.permute.xlu0 %v652_v11 }
  0x39   : > { %436 = vperm.xlu0 %624, %v271_v7  }
  0x3a   : > { %622 = vset.pattern.permute.xlu2 %v652_v11 }
  0x3b   : > { %424 = vperm.xlu2 %622, %v268_v3   ;;  %v266_v3 = vld [vmem:[%s745_s14 + $0x38] sm:$0xff] }
  0x40   : > { %623 = vset.pattern.permute.xlu1 %v652_v11 }
  0x41   : > { %428 = vperm.xlu1 %623, %v269_v6  }
  0x43   : > { %432 = vperm.xlu2 %622, %v270_v8  }
  0x6a   : > { %v307_v12 = vpop.permute.xlu2 %306 }
  0x6b   : > { %v331_v33 = vmul.f32 %v747_v26, %v307_v12  ;;  %v332_v37 = vmul.f32 %v749_v29, %v307_v12 }
  0x72   : > { %v722_v13 = vpop.permute.xlu2 %311 }
  0x7b   : > { %v349_v14 = vpop.permute.xlu2 %348 }
  0x7c   : > { %v369_v48 = vmul.f32 %v754_v35, %v349_v14  ;;  %v370_v52 = vmul.f32 %v756_v36, %v349_v14 }
  0x80   : > { %v289_v15 = vpop.permute.xlu1 %288  ;;  %v279_v16 = vpop.permute.xlu0 %278 }
  0x81   : > { %v296_v34 = vadd.f32 %v279_v16, %v259_v30  ;;  %v297_v38 = vadd.f32 %v279_v16, %v260_v32  ;;  %v300_v55 = vadd.f32 %v289_v15, %v263_v43  ;;  %v301_v56 = vadd.f32 %v289_v15, %v264_v44 }
  0x82   : > { %v333_v43 = vmul.f32 %v747_v26, %v722_v13  ;;  %v334_v44 = vmul.f32 %v749_v29, %v722_v13 }
  0x83   : > { %v724_v17 = vpop.permute.xlu2 %360  ;;  %v339_v47 = vadd.f32 %v331_v33, %v296_v34  ;;  %v340_v51 = vadd.f32 %v332_v37, %v297_v38  ;;  %v261_v33 = vld [vmem:[%s745_s14 + $0x10] sm:$0xff]  ;;  %v262_v34 = vld [vmem:[%s745_s14 + $0x18] sm:$0xff] }
  0x85   : > { %v377_v61 = vadd.f32 %v369_v48, %v339_v47  ;;  %v378_v1 = vadd.f32 %v370_v52, %v340_v51 }
  0x88   : > { %v727_v18 = vpop.permute.xlu1 %293  ;;  %v729_v19 = vpop.permute.xlu0 %283 }
  0x89   : > { %v302_v22 = vadd.f32 %v727_v18, %v265_v2  ;;  %v298_v45 = vadd.f32 %v729_v19, %v261_v33 }
  0x8c   : > { %v734_v20 = vpop.permute.xlu2 %390 }
  0x90   : > { %v322_v23 = vpop.permute.xlu1 %321  ;;  %v317_v24 = vpop.permute.xlu0 %316 }
  0x91   : > { %v335_v49 = vmul.f32 %v747_v26, %v317_v24  ;;  %v336_v50 = vmul.f32 %v749_v29, %v317_v24  ;;  %v337_v4 = vmul.f32 %v747_v26, %v322_v23  ;;  %v338_v5 = vmul.f32 %v749_v29, %v322_v23 }
  0x92   : > { %v303_v23 = vadd.f32 %v727_v18, %v266_v3  ;;  %v376_v18 = vmul.f32 %v756_v36, %v724_v17 }
  0x93   : > { %v343_v62 = vadd.f32 %v335_v49, %v300_v55  ;;  %v344_v63 = vadd.f32 %v336_v50, %v301_v56  ;;  %v345_v32 = vadd.f32 %v337_v4, %v302_v22  ;;  %v341_v56 = vadd.f32 %v333_v43, %v298_v45 }
  0x94   : > { %v346_v37 = vadd.f32 %v338_v5, %v303_v23 }
  0x95   : > { %v425_v31 = vpop.permute.xlu2 %424 }
  0x96   : > { %v445_v6 = vmul.f32 %v767_v53, %v425_v31  ;;  %v446_v9 = vmul.f32 %v769_v54, %v425_v31  ;;  %v375_v31 = vmul.f32 %v754_v35, %v724_v17  ;;  %v299_v17 = vadd.f32 %v729_v19, %v262_v34 }
  0x97   : > { %v384_v48 = vadd.f32 %v376_v18, %v346_v37 }
  0x98   : > { %v383_v47 = vadd.f32 %v375_v31, %v345_v32 }
  0x99   : > { %v357_v39 = vpop.permute.xlu1 %356  ;;  %v759_v40 = vpop.permute.xlu0 %352 }
  0x9a   : > { %v373_v57 = vmul.f32 %v754_v35, %v357_v39  ;;  %v374_v58 = vmul.f32 %v756_v36, %v357_v39  ;;  %v371_v26 = vmul.f32 %v754_v35, %v759_v40  ;;  %v372_v13 = vmul.f32 %v756_v36, %v759_v40 }
  0x9b   : > { %v409_v35 = vmul.f32 %v773_v59, %v734_v20 }
  0x9c   : > { %v381_v7 = vadd.f32 %v373_v57, %v343_v62  ;;  %v382_v8 = vadd.f32 %v374_v58, %v344_v63  ;;  %v342_v57 = vadd.f32 %v334_v44, %v299_v17  ;;  %v379_v62 = vadd.f32 %v371_v26, %v341_v56 }
  0x9d   : > { %v433_v60 = vpop.permute.xlu2 %432 }
  0x9e   : > { %v449_v12 = vmul.f32 %v767_v53, %v433_v60  ;;  %v450_v24 = vmul.f32 %v769_v54, %v433_v60  ;;  %v380_v36 = vadd.f32 %v372_v13, %v342_v57  ;;  %v417_v63 = vadd.f32 %v409_v35, %v379_v62 }
  0xa2   : > { %v395_v10 = vpop.permute.xlu0 %394  ;;  %v387_v11 = vpop.permute.xlu1 %386 }
  0xa3   : > { %v411_v14 = vmul.f32 %v773_v59, %v395_v10  ;;  %v412_v15 = vmul.f32 %v406_v0, %v395_v10  ;;  %v407_v16 = vmul.f32 %v773_v59, %v387_v11  ;;  %v408_v21 = vmul.f32 %v406_v0, %v387_v11 }
  0xa5   : > { %v419_v25 = vadd.f32 %v411_v14, %v381_v7  ;;  %v420_v27 = vadd.f32 %v412_v15, %v382_v8  ;;  %v415_v28 = vadd.f32 %v407_v16, %v377_v61  ;;  %v416_v30 = vadd.f32 %v408_v21, %v378_v1 }
  0xa6   : > { %v410_v61 = vmul.f32 %v406_v0, %v734_v20 }
  0xa7   : > { %v453_v38 = vadd.f32 %v445_v6, %v415_v28  ;;  %v454_v39 = vadd.f32 %v446_v9, %v416_v30  ;;  %v457_v41 = vadd.f32 %v449_v12, %v419_v25  ;;  %v458_v42 = vadd.f32 %v450_v24, %v420_v27 }
  0xa8   : > { %v418_v1 = vadd.f32 %v410_v61, %v380_v36 }
  0xa9   : > { %461 = vst [vmem:[%s792_s21] sm:$0xff] %v453_v38 }
  0xaa   : > { %462 = vst [vmem:[%s792_s21 + $0x8] sm:$0xff] %v454_v39  ;;  %v399_v46 = vpop.permute.xlu1 %398 }
  0xab   : > { %465 = vst [vmem:[%s792_s21 + $0x20] sm:$0xff] %v457_v41  ;;  %v413_v49 = vmul.f32 %v773_v59, %v399_v46  ;;  %v414_v50 = vmul.f32 %v406_v0, %v399_v46  ;;  %v437_v51 = vpop.permute.xlu0 %436 }
  0xac   : > { %466 = vst [vmem:[%s792_s21 + $0x28] sm:$0xff] %v458_v42  ;;  %v451_v19 = vmul.f32 %v767_v53, %v437_v51  ;;  %v452_v29 = vmul.f32 %v769_v54, %v437_v51 }
  0xad   : > { %v421_v52 = vadd.f32 %v413_v49, %v383_v47  ;;  %v422_v55 = vadd.f32 %v414_v50, %v384_v48 }
  0xaf   : > { %v459_v58 = vadd.f32 %v451_v19, %v421_v52  ;;  %v460_v60 = vadd.f32 %v452_v29, %v422_v55 }
  0xb1   : > { %467 = vst [vmem:[%s792_s21 + $0x30] sm:$0xff] %v459_v58 }
  0xb2   : > { %468 = vst [vmem:[%s792_s21 + $0x38] sm:$0xff] %v460_v60 }
  0xb3   : > { %v429_v40 = vpop.permute.xlu1 %428 }
  0xb4   : > { %v447_v2 = vmul.f32 %v767_v53, %v429_v40  ;;  %v448_v3 = vmul.f32 %v769_v54, %v429_v40 }
  0xb6   : > { %v455_v4 = vadd.f32 %v447_v2, %v417_v63  ;;  %v456_v5 = vadd.f32 %v448_v3, %v418_v1 }
  0xb8   : > { %463 = vst [vmem:[%s792_s21 + $0x10] sm:$0xff] %v455_v4 }
  0xb9   : > { %464 = vst [vmem:[%s792_s21 + $0x18] sm:$0xff] %v456_v5 }
  0xba PF: > { %s14_s17 = sadd.s32 1, %s647_s17   ;;  %s840_s15 = smov %s643_s16 }
  0xbb   : > { %p11_p5 = scmp.ge.s32.totalorder %s14_s17, 4   ;;  %s841_s16 = smov %s843_s18 }
  0xbd   :  { %13 = sbr.rel (!%p11_p5) target bundleno = 2 (0x2), region = 69 }

</bundles_post_ra>
